<compile_context>
chip_gen: v7x
topology: tpu7x:2x2x1
jax: 0.10.0
libtpu: 0.0.40
codegen_flags: <defaults>
</compile_context>

<pallas_src>
import functools
import math

import jax
import jax.numpy as jnp
from jax.experimental import pallas as pl
from jax.experimental.pallas import tpu as pltpu


# ----------------------------------------------------------------------------
# Fused GRU-cell kernel (everything in the transposed, lane-dense layout)
#   update^T = clip(sigmoid(gz^T[:, :r]   + uq^T[:, :r]  + b^T[:, :r]))
#   reset^T  = clip(sigmoid(gz^T[:, r:2r] + uq^T[:, r:]  + b^T[:, r:2r]))
#   hcap^T   = clip(tanh(gz^T[:, 2r:] + (reset^T*Q^T) @ Uh^T + b^T[:, 2r:]))
#   newQ^T   = (1-update^T)*Q^T + update^T*hcap^T
# ----------------------------------------------------------------------------
def _gru_cell_kernel(z_ref, qT_ref, wzrhT_ref, uurT_ref, uhT_ref, bT_ref,
                     out_ref, *, matmul_dtype):
    eps = 1e-4
    rows = qT_ref.shape[1]                      # qT is (cols, rows)

    qT = qT_ref[...]                            # (cols, rows) f32
    z = z_ref[...]                              # (cols, rows), already *tanh(score)

    z_m = z.astype(matmul_dtype)
    qT_m = qT.astype(matmul_dtype)

    # 3 fused MXU contractions, all canonical (m,k)x(k,n), lane axis = rows.
    gzT = jnp.dot(z_m, wzrhT_ref[...],
                  preferred_element_type=jnp.float32)     # (cols, 3*rows)
    uqT = jnp.dot(qT_m, uurT_ref[...],
                  preferred_element_type=jnp.float32)     # (cols, 2*rows)
    bT = bT_ref[...]                                      # (cols, 3*rows)

    def _sigmoid(x):
        # single EUP push per element (vs. exp + reciprocal)
        return 0.5 * (jnp.tanh(0.5 * x) + 1.0)

    # reset first: lets the dependent Uh matmul start before update's tail.
    pre_r = gzT[:, rows:2 * rows] + uqT[:, rows:] + bT[:, rows:2 * rows]
    reset = jnp.clip(_sigmoid(pre_r), eps, 1.0 - eps)     # (cols, rows)

    h_in = (reset * qT).astype(matmul_dtype)
    pre_h = (gzT[:, 2 * rows:]
             + jnp.dot(h_in, uhT_ref[...],
                       preferred_element_type=jnp.float32)
             + bT[:, 2 * rows:])

    pre_u = gzT[:, :rows] + uqT[:, :rows] + bT[:, :rows]
    update = jnp.clip(_sigmoid(pre_u), eps, 1.0 - eps)    # (cols, rows)

    h_cap = jnp.clip(jnp.tanh(pre_h), -(1.0 - eps), 1.0 - eps)

    out_ref[...] = (1.0 - update) * qT + update * h_cap   # new_Q^T (cols, rows)


def _full_spec(shape):
    return pl.BlockSpec(shape, lambda i: (0,) * len(shape))


def pack_params(params, *, matmul_dtype=jnp.float32):
    """Fold the six gate weights / three biases into 3 pre-transposed matmul
    operands + 1 transposed bias, pre-cast to matmul_dtype (static params, done
    once outside the per-step hot path).

    matmul_dtype=jnp.bfloat16 is MXU-native on all generations (incl. v5e) and
    halves weight DMA bytes; use it once rows >= ~256 (f32 below to keep tight
    tolerances). Accumulation and the elementwise tail stay f32 either way.
    """
    wzrh = jnp.concatenate([params["Wu"], params["Wr"], params["Wh"]], axis=0)
    uur = jnp.concatenate([params["Uu"], params["Ur"]], axis=0)
    b_all = jnp.concatenate([params["bu"], params["br"], params["bh"]], axis=0)
    return {
        "WzrhT": wzrh.T.astype(matmul_dtype),          # (rows, 3*rows)
        "UurT": uur.T.astype(matmul_dtype),            # (rows, 2*rows)
        "UhT": params["Uh"].T.astype(matmul_dtype),    # (rows, rows)
        "bT": b_all.T.astype(jnp.float32),             # (cols, 3*rows)
        "scorer": params["scorer"].astype(jnp.float32),  # (rows, 1)
    }


def _gru_tail_jax(z_sel, q_T, packed):
    """Plain-JAX tail (same transposed math) for small shapes where the Pallas
    dispatch overhead outweighs the fusion win."""
    eps = 1e-4
    rows = q_T.shape[1]
    mdt = packed["WzrhT"].dtype
    gzT = jnp.dot(z_sel.astype(mdt), packed["WzrhT"],
                  preferred_element_type=jnp.float32)
    uqT = jnp.dot(q_T.astype(mdt), packed["UurT"],
                  preferred_element_type=jnp.float32)
    bT = packed["bT"]
    sig = lambda x: 0.5 * (jnp.tanh(0.5 * x) + 1.0)
    reset = jnp.clip(sig(gzT[:, rows:2 * rows] + uqT[:, rows:]
                         + bT[:, rows:2 * rows]), eps, 1.0 - eps)
    update = jnp.clip(sig(gzT[:, :rows] + uqT[:, :rows] + bT[:, :rows]),
                      eps, 1.0 - eps)
    pre_h = (gzT[:, 2 * rows:]
             + jnp.dot((reset * q_T).astype(mdt), packed["UhT"],
                       preferred_element_type=jnp.float32)
             + bT[:, 2 * rows:])
    h_cap = jnp.clip(jnp.tanh(pre_h), -(1.0 - eps), 1.0 - eps)
    return (1.0 - update) * q_T + update * h_cap


def mat_gru_cell(prev_Q, prev_Z, packed, *, use_pallas=None, interpret=False):
    """Forward pass of mat_GRU_cell.

    prev_Q: (rows, cols) float32 GRU state.
    prev_Z: (num_nodes, rows) float32 node embeddings.
    packed: output of pack_params().
    use_pallas: None = auto (Pallas only once rows >= 128; below that the fused
    XLA HLO beats the fixed custom-call overhead). True/False to force.
    """
    rows, cols = prev_Q.shape
    num_nodes = prev_Z.shape[0]
    matmul_dtype = packed["WzrhT"].dtype

    # ---- TopK scoring + selection (plain JAX; XLA fuses around top_k). ------
    # A GEMV with output lane-width 1 wastes the MXU and forces masked stores,
    # so it stays outside Pallas; the norm scalar and the tanh(score) scaling
    # are hoisted here too (fused with the gather by XLA).
    scorer = packed["scorer"]                                    # (rows, 1)
    scores = (prev_Z @ scorer).reshape(-1) / jnp.linalg.norm(scorer)
    k_eff = min(cols, num_nodes)
    vals, idx = jax.lax.top_k(scores, k_eff)
    # pad_with_last_val semantics: drop -inf scores / short top_k, repeat the
    # last valid index up to k.
    num_finite = jnp.sum(vals > -jnp.inf)
    last_valid = idx[jnp.maximum(num_finite - 1, 0)]
    idx = jnp.where(jnp.arange(k_eff) < num_finite, idx, last_valid)
    if k_eff < cols:
        idx = jnp.concatenate(
            [idx, jnp.broadcast_to(last_valid, (cols - k_eff,))])
    # TODO(synk): sparse-tensor (to_dense) input branch is not implemented.
    z_sel = (jnp.take(prev_Z, idx, axis=0)
             * jnp.tanh(jnp.take(scores, idx).reshape(cols, 1)))  # (cols, rows)

    q_T = prev_Q.T                                               # (cols, rows)

    if use_pallas is None:
        use_pallas = rows >= 128
    if not use_pallas:
        return _gru_tail_jax(z_sel, q_T, packed).T

    in_arrays = [
        z_sel, q_T,
        packed["WzrhT"], packed["UurT"], packed["UhT"], packed["bT"],
    ]
    # Explicit VMEM budget from the actual buffer sizes (x2 slack for
    # double-buffering + intermediates), capped at v7x's 64 MiB physical VMEM.
    nbytes = sum(int(a.size) * a.dtype.itemsize for a in in_arrays)
    nbytes += int(q_T.size) * 4
    vmem_limit = int(min(64 * 1024 * 1024,
                         max(16 * 1024 * 1024, 2 * nbytes + (2 << 20))))

    kernel = functools.partial(_gru_cell_kernel, matmul_dtype=matmul_dtype)
    # TODO(synk): when batching many independent cells / timesteps per call,
    # add a leading "parallel" grid axis (uses v7x's 2nd TensorCore) and mark
    # the grid-invariant weight BlockSpecs with pipeline_mode=pl.Buffered(1).
    out_T = pl.pallas_call(
        kernel,
        out_shape=jax.ShapeDtypeStruct((cols, rows), jnp.float32),
        grid=(1,),
        in_specs=[_full_spec(a.shape) for a in in_arrays],
        out_specs=_full_spec((cols, rows)),
        input_output_aliases={1: 0},   # q_T (wrapper temp) donated to new_Q^T
        compiler_params=pltpu.CompilerParams(
            dimension_semantics=("arbitrary",),
            vmem_limit_bytes=vmem_limit),
        interpret=interpret,
    )(*in_arrays)
    return out_T.T


# ----------------------------------------------------------------------------
# Pure-JAX reference (mirrors the PyTorch module exactly)
# ----------------------------------------------------------------------------
def mat_gru_cell_ref(prev_Q, prev_Z, params):
    rows, cols = prev_Q.shape
    scorer = params["scorer"]
    scores = prev_Z @ scorer / jnp.linalg.norm(scorer)
    vals, idx = jax.lax.top_k(scores.reshape(-1), cols)
    z_topk = (prev_Z[idx] * jnp.tanh(scores[idx].reshape(-1, 1))).T
    eps = 1e-4

    def gate(W, U, b, x, h, act):
        return act(W @ x + U @ h + b)

    update = jnp.clip(gate(params["Wu"], params["Uu"], params["bu"],
                           z_topk, prev_Q, jax.nn.sigmoid), eps, 1 - eps)
    reset = jnp.clip(gate(params["Wr"], params["Ur"], params["br"],
                          z_topk, prev_Q, jax.nn.sigmoid), eps, 1 - eps)
    h_cap = reset * prev_Q
    h_cap = jnp.clip(gate(params["Wh"], params["Uh"], params["bh"],
                          z_topk, h_cap, jax.nn.tanh), -(1 - eps), 1 - eps)
    return (1 - update) * prev_Q + update * h_cap


# ----------------------------------------------------------------------------
# Deterministic parameter init (shapes / uniform(-stdv, stdv) as in __init__)
# ----------------------------------------------------------------------------
def init_params(key, rows, cols):
    stdv = 1.0 / math.sqrt(rows)
    ks = jax.random.split(key, 7)

    def u(k, shape):
        return jax.random.uniform(k, shape, jnp.float32, -stdv, stdv)

    return {
        "Wu": u(ks[0], (rows, rows)), "Uu": u(ks[1], (rows, rows)),
        "bu": jnp.zeros((rows, cols), jnp.float32),
        "Wr": u(ks[2], (rows, rows)), "Ur": u(ks[3], (rows, rows)),
        "br": jnp.zeros((rows, cols), jnp.float32),
        "Wh": u(ks[4], (rows, rows)), "Uh": u(ks[5], (rows, rows)),
        "bh": jnp.zeros((rows, cols), jnp.float32),
        "scorer": u(ks[6], (rows, 1)),
    }


if __name__ == "__main__":
    rows, cols, num_nodes = 32, 16, 64     # feats=rows, k=cols

    key = jax.random.PRNGKey(0)
    kp, kq, kz = jax.random.split(key, 3)
    params = init_params(kp, rows, cols)
    packed = pack_params(params)           # f32 weights at this small shape
    prev_Q = jax.random.normal(kq, (rows, cols), jnp.float32)
    prev_Z = jax.random.normal(kz, (num_nodes, rows), jnp.float32)

    # Force the Pallas path (the auto policy would use the plain-JAX tail at
    # this dispatch-bound 32x16 shape).
    new_Q = mat_gru_cell(prev_Q, prev_Z, packed, use_pallas=True)
    new_Q = jax.block_until_ready(new_Q)

    ref = mat_gru_cell_ref(prev_Q, prev_Z, params)
    assert new_Q.shape == (rows, cols)
    assert jnp.allclose(new_Q, ref, atol=1e-3, rtol=1e-3), "mismatch vs reference"

    # Also sanity-check the small-shape fallback path agrees.
    fb = jax.block_until_ready(mat_gru_cell(prev_Q, prev_Z, packed,
                                            use_pallas=False))
    assert jnp.allclose(fb, ref, atol=1e-3, rtol=1e-3), "fallback mismatch"

    print("KERNEL_OK")
</pallas_src>

<mosaic_0001>
module attributes {stable_mosaic.version = 11 : i64} {
  func.func @_gru_cell_kernel(%arg0: i32, %arg1: memref<16x32xf32, #tpu.memory_space<vmem>>, %arg2: memref<16x32xf32, #tpu.memory_space<vmem>>, %arg3: memref<32x96xf32, #tpu.memory_space<vmem>>, %arg4: memref<32x64xf32, #tpu.memory_space<vmem>>, %arg5: memref<32x32xf32, #tpu.memory_space<vmem>>, %arg6: memref<16x96xf32, #tpu.memory_space<vmem>>, %arg7: memref<16x32xf32, #tpu.memory_space<vmem>>) attributes {dimension_semantics = [#tpu.dimension_semantics<arbitrary>], iteration_bounds = array<i64: 1>, scalar_prefetch = 0 : i64, scratch_operands = 0 : i64, tpu.core_type = #tpu.core_type<tc>, window_params = [{pipeline_mode = #tpu.pipeline_mode<synchronous>, transform_indices = @transform_0, window_bounds = array<i64: 16, 32>}, {pipeline_mode = #tpu.pipeline_mode<synchronous>, transform_indices = @transform_1, window_bounds = array<i64: 16, 32>}, {pipeline_mode = #tpu.pipeline_mode<synchronous>, transform_indices = @transform_2, window_bounds = array<i64: 32, 96>}, {pipeline_mode = #tpu.pipeline_mode<synchronous>, transform_indices = @transform_3, window_bounds = array<i64: 32, 64>}, {pipeline_mode = #tpu.pipeline_mode<synchronous>, transform_indices = @transform_4, window_bounds = array<i64: 32, 32>}, {pipeline_mode = #tpu.pipeline_mode<synchronous>, transform_indices = @transform_5, window_bounds = array<i64: 16, 96>}, {pipeline_mode = #tpu.pipeline_mode<synchronous>, transform_indices = @transform_6, window_bounds = array<i64: 16, 32>}]} {
    %c0 = arith.constant 0 : index
    %c0_0 = arith.constant 0 : index
    %0 = vector.load %arg2[%c0, %c0_0] : memref<16x32xf32, #tpu.memory_space<vmem>>, vector<16x32xf32>
    %c0_1 = arith.constant 0 : index
    %c0_2 = arith.constant 0 : index
    %1 = vector.load %arg1[%c0_1, %c0_2] : memref<16x32xf32, #tpu.memory_space<vmem>>, vector<16x32xf32>
    %c0_3 = arith.constant 0 : index
    %c0_4 = arith.constant 0 : index
    %2 = vector.load %arg3[%c0_3, %c0_4] : memref<32x96xf32, #tpu.memory_space<vmem>>, vector<32x96xf32>
    %cst = arith.constant dense<0.000000e+00> : vector<16x96xf32>
    %3 = tpu.matmul %1, %2, %cst {dimension_numbers = #tpu.dot_dimension_numbers<[1], [0], [0], [1], [0, 0, 1, 1], [], []>} : vector<16x32xf32>, vector<32x96xf32>, vector<16x96xf32> -> vector<16x96xf32>
    %c0_5 = arith.constant 0 : index
    %c0_6 = arith.constant 0 : index
    %4 = vector.load %arg4[%c0_5, %c0_6] : memref<32x64xf32, #tpu.memory_space<vmem>>, vector<32x64xf32>
    %cst_7 = arith.constant dense<0.000000e+00> : vector<16x64xf32>
    %5 = tpu.matmul %0, %4, %cst_7 {dimension_numbers = #tpu.dot_dimension_numbers<[1], [0], [0], [1], [0, 0, 1, 1], [], []>} : vector<16x32xf32>, vector<32x64xf32>, vector<16x64xf32> -> vector<16x64xf32>
    %c0_8 = arith.constant 0 : index
    %c0_9 = arith.constant 0 : index
    %6 = vector.load %arg6[%c0_8, %c0_9] : memref<16x96xf32, #tpu.memory_space<vmem>>, vector<16x96xf32>
    %7 = vector.extract_strided_slice %3 {offsets = [0, 32], sizes = [16, 32], strides = [1, 1]} : vector<16x96xf32> to vector<16x32xf32>
    %8 = vector.extract_strided_slice %5 {offsets = [0, 32], sizes = [16, 32], strides = [1, 1]} : vector<16x64xf32> to vector<16x32xf32>
    %9 = arith.addf %7, %8 : vector<16x32xf32>
    %10 = vector.extract_strided_slice %6 {offsets = [0, 32], sizes = [16, 32], strides = [1, 1]} : vector<16x96xf32> to vector<16x32xf32>
    %11 = arith.addf %9, %10 : vector<16x32xf32>
    %cst_10 = arith.constant 5.000000e-01 : f32
    %12 = vector.broadcast %cst_10 : f32 to vector<16x32xf32>
    %13 = arith.mulf %12, %11 : vector<16x32xf32>
    %14 = math.tanh %13 : vector<16x32xf32>
    %cst_11 = arith.constant 1.000000e+00 : f32
    %15 = vector.broadcast %cst_11 : f32 to vector<16x32xf32>
    %16 = arith.addf %14, %15 : vector<16x32xf32>
    %cst_12 = arith.constant 5.000000e-01 : f32
    %17 = vector.broadcast %cst_12 : f32 to vector<16x32xf32>
    %18 = arith.mulf %17, %16 : vector<16x32xf32>
    %cst_13 = arith.constant 9.99999974E-5 : f32
    %cst_14 = arith.constant 0.999899983 : f32
    %19 = vector.broadcast %cst_13 : f32 to vector<16x32xf32>
    %20 = arith.maximumf %19, %18 : vector<16x32xf32>
    %21 = vector.broadcast %cst_14 : f32 to vector<16x32xf32>
    %22 = arith.minimumf %21, %20 : vector<16x32xf32>
    %23 = arith.mulf %22, %0 : vector<16x32xf32>
    %24 = vector.extract_strided_slice %3 {offsets = [0, 64], sizes = [16, 32], strides = [1, 1]} : vector<16x96xf32> to vector<16x32xf32>
    %c0_15 = arith.constant 0 : index
    %c0_16 = arith.constant 0 : index
    %25 = vector.load %arg5[%c0_15, %c0_16] : memref<32x32xf32, #tpu.memory_space<vmem>>, vector<32x32xf32>
    %cst_17 = arith.constant dense<0.000000e+00> : vector<16x32xf32>
    %26 = tpu.matmul %23, %25, %cst_17 {dimension_numbers = #tpu.dot_dimension_numbers<[1], [0], [0], [1], [0, 0, 1, 1], [], []>} : vector<16x32xf32>, vector<32x32xf32>, vector<16x32xf32> -> vector<16x32xf32>
    %27 = arith.addf %24, %26 : vector<16x32xf32>
    %28 = vector.extract_strided_slice %6 {offsets = [0, 64], sizes = [16, 32], strides = [1, 1]} : vector<16x96xf32> to vector<16x32xf32>
    %29 = arith.addf %27, %28 : vector<16x32xf32>
    %30 = vector.extract_strided_slice %3 {offsets = [0, 0], sizes = [16, 32], strides = [1, 1]} : vector<16x96xf32> to vector<16x32xf32>
    %31 = vector.extract_strided_slice %5 {offsets = [0, 0], sizes = [16, 32], strides = [1, 1]} : vector<16x64xf32> to vector<16x32xf32>
    %32 = arith.addf %30, %31 : vector<16x32xf32>
    %33 = vector.extract_strided_slice %6 {offsets = [0, 0], sizes = [16, 32], strides = [1, 1]} : vector<16x96xf32> to vector<16x32xf32>
    %34 = arith.addf %32, %33 : vector<16x32xf32>
    %cst_18 = arith.constant 5.000000e-01 : f32
    %35 = vector.broadcast %cst_18 : f32 to vector<16x32xf32>
    %36 = arith.mulf %35, %34 : vector<16x32xf32>
    %37 = math.tanh %36 : vector<16x32xf32>
    %cst_19 = arith.constant 1.000000e+00 : f32
    %38 = vector.broadcast %cst_19 : f32 to vector<16x32xf32>
    %39 = arith.addf %37, %38 : vector<16x32xf32>
    %cst_20 = arith.constant 5.000000e-01 : f32
    %40 = vector.broadcast %cst_20 : f32 to vector<16x32xf32>
    %41 = arith.mulf %40, %39 : vector<16x32xf32>
    %cst_21 = arith.constant 9.99999974E-5 : f32
    %cst_22 = arith.constant 0.999899983 : f32
    %42 = vector.broadcast %cst_21 : f32 to vector<16x32xf32>
    %43 = arith.maximumf %42, %41 : vector<16x32xf32>
    %44 = vector.broadcast %cst_22 : f32 to vector<16x32xf32>
    %45 = arith.minimumf %44, %43 : vector<16x32xf32>
    %46 = math.tanh %29 : vector<16x32xf32>
    %cst_23 = arith.constant -0.999899983 : f32
    %cst_24 = arith.constant 0.999899983 : f32
    %47 = vector.broadcast %cst_23 : f32 to vector<16x32xf32>
    %48 = arith.maximumf %47, %46 : vector<16x32xf32>
    %49 = vector.broadcast %cst_24 : f32 to vector<16x32xf32>
    %50 = arith.minimumf %49, %48 : vector<16x32xf32>
    %cst_25 = arith.constant 1.000000e+00 : f32
    %51 = vector.broadcast %cst_25 : f32 to vector<16x32xf32>
    %52 = arith.subf %51, %45 : vector<16x32xf32>
    %53 = arith.mulf %52, %0 : vector<16x32xf32>
    %54 = arith.mulf %45, %50 : vector<16x32xf32>
    %55 = arith.addf %53, %54 : vector<16x32xf32>
    %c0_26 = arith.constant 0 : index
    %c0_27 = arith.constant 0 : index
    %56 = vector.load %arg7[%c0_26, %c0_27] : memref<16x32xf32, #tpu.memory_space<vmem>>, vector<16x32xf32>
    tpu.vector_store %arg7[%c0_26, %c0_27], %55 {strides = array<i32>} : memref<16x32xf32, #tpu.memory_space<vmem>>, vector<16x32xf32>,
    return
  }
  func.func @transform_0(%arg0: i32) -> (i32, i32) {
    %c0_i32 = arith.constant 0 : i32
    %c0_i32_0 = arith.constant 0 : i32
    %c0_i32_1 = arith.constant 0 : i32
    return %c0_i32, %c0_i32_0 : i32, i32
  }
  func.func @transform_1(%arg0: i32) -> (i32, i32) {
    %c0_i32 = arith.constant 0 : i32
    %c0_i32_0 = arith.constant 0 : i32
    %c0_i32_1 = arith.constant 0 : i32
    return %c0_i32, %c0_i32_0 : i32, i32
  }
  func.func @transform_2(%arg0: i32) -> (i32, i32) {
    %c0_i32 = arith.constant 0 : i32
    %c0_i32_0 = arith.constant 0 : i32
    %c0_i32_1 = arith.constant 0 : i32
    return %c0_i32, %c0_i32_0 : i32, i32
  }
  func.func @transform_3(%arg0: i32) -> (i32, i32) {
    %c0_i32 = arith.constant 0 : i32
    %c0_i32_0 = arith.constant 0 : i32
    %c0_i32_1 = arith.constant 0 : i32
    return %c0_i32, %c0_i32_0 : i32, i32
  }
  func.func @transform_4(%arg0: i32) -> (i32, i32) {
    %c0_i32 = arith.constant 0 : i32
    %c0_i32_0 = arith.constant 0 : i32
    %c0_i32_1 = arith.constant 0 : i32
    return %c0_i32, %c0_i32_0 : i32, i32
  }
  func.func @transform_5(%arg0: i32) -> (i32, i32) {
    %c0_i32 = arith.constant 0 : i32
    %c0_i32_0 = arith.constant 0 : i32
    %c0_i32_1 = arith.constant 0 : i32
    return %c0_i32, %c0_i32_0 : i32, i32
  }
  func.func @transform_6(%arg0: i32) -> (i32, i32) {
    %c0_i32 = arith.constant 0 : i32
    %c0_i32_0 = arith.constant 0 : i32
    %c0_i32_1 = arith.constant 0 : i32
    return %c0_i32, %c0_i32_0 : i32, i32
  }
}

</mosaic_0001>

<bundles_post_ra>
// kernel: tpu_custom_call.1
= control target key start
LH: loop header
LB: loop body
LE: loop exit
PB: predicated region body
PF: predicated region fallthrough
CT: control target
= control target key end

     0   :  { %11 = vsyncpa [#allocation3], 0  ;;  %s813_s0 = inlined_call_operand.vmem [shape: f32[16,32], index: 0, kind: input, shape index: {}]   ;;  %s814_s1 = inlined_call_operand.hbm [shape: f32[16,32], index: 1, kind: input, shape index: {}, may-alias: {1,6}]   ;;  %s815_s2 = inlined_call_operand.vmem [shape: f32[32,96], index: 2, kind: input, shape index: {}]   ;;  %s816_s3 = inlined_call_operand.hbm [shape: f32[32,64], index: 3, kind: input, shape index: {}]   ;;  %s817_s4 = inlined_call_operand.hbm [shape: f32[32,32], index: 4, kind: input, shape index: {}]   ;;  %s818_s5 = inlined_call_operand.hbm [shape: f32[16,96], index: 5, kind: input, shape index: {}]   ;;  %s819_s6 = inlined_call_operand.hbm [shape: f32[16,32], index: 6, kind: output, shape index: {}, may-alias: {1,6}]  }
   0x1   :  { %12 = vsyncpa [#allocation6], 0 }
   0x2   :  { %13 = vsyncpa [#allocation9], 0 }
   0x3   :  { %14 = vsyncpa [#allocation4], 0  ;;  %s643_s21 = smov [#allocation5]   ;;  %s644_s23 = smov [#allocation2]  }
   0x4   :  { %s36_s22 = sshll.u32 %s643_s21, 4  ;;  %s22_s24 = sshll.u32 %s644_s23, 4  ;;  %s37_s22 = int_to_ptr.vmem [resolvable:$true] %s36_s22  ;;  %s688_s24 = int_to_ptr.vmem [resolvable:$true] %s22_s24 }
   0x5   :  { %s525_s27 = scalar_lea.hbm %s816_s3, 512 }
   0x6   :  { %p526_p0 = scmp.ne.s32.totalorder %s816_s3, %s525_s27  ;;  %p529_p1 = scmp.lt.u32.totalorder %s525_s27, %s816_s3 }
   0x8   :  { %p531_p2 = pnand %p529_p1, %p526_p0 }
   0xa   :  { %534 = shalt.err (!%p531_p2)
}
   0xb   :  { %s535_s8 = scalar_lea.vmem %s37_s22, 512  ;;  %p540_p4 = scmp.lt.s32.totalorder %s37_s22, %s37_s22 }
   0xc   :  { %p536_p3 = scmp.ne.s32.totalorder %s37_s22, %s535_s8  ;;  %p541_p5 = scmp.lt.s32.totalorder %s535_s8, %s535_s8 }
   0xe   :  { %p542_p6 = por %p541_p5, %p540_p4 }
  0x10   :  { %p543_p7 = pnand %p542_p6, %p536_p3 }
  0x12   :  { %546 = shalt.err (!%p543_p7)
}
  0x13   :  { %s645_s9 = smov 128   ;;  %s646_s10 = smov 8  }
  0x14   :  { %42 = dma.hbm_to_vmem [thread:$0]  %s816_s3, 512, %s37_s22, [#allocation6], %s645_s9, %s645_s9, %s646_s10  }
  0x15   :  { %s547_s15 = scalar_lea.hbm %s814_s1, 256 }
  0x16   :  { %p548_p8 = scmp.ne.s32.totalorder %s814_s1, %s547_s15  ;;  %p551_p9 = scmp.lt.u32.totalorder %s547_s15, %s814_s1 }
  0x18   :  { %p553_p10 = pnand %p551_p9, %p548_p8 }
  0x1a   :  { %556 = shalt.err (!%p553_p10)
}
  0x1b   :  { %s557_s20 = scalar_lea.vmem %s688_s24, 256  ;;  %p562_p12 = scmp.lt.s32.totalorder %s688_s24, %s688_s24 }
  0x1c   :  { %p558_p11 = scmp.ne.s32.totalorder %s688_s24, %s557_s20  ;;  %p563_p13 = scmp.lt.s32.totalorder %s557_s20, %s557_s20 }
  0x1e   :  { %p564_p0 = por %p563_p13, %p562_p12 }
  0x20   :  { %p565_p1 = pnand %p564_p0, %p558_p11 }
  0x22   :  { %568 = shalt.err (!%p565_p1)
}
  0x23   :  { %28 = dma.hbm_to_vmem [thread:$0]  %s814_s1, 256, %s688_s24, [#allocation3], %s645_s9, %s645_s9, %s646_s10  }
  0x24   :  { %s647_s22 = smov [#allocation7]   ;;  %s648_s25 = smov [#allocation8]  }
  0x25   :  { %s48_s23 = sshll.u32 %s647_s22, 4  ;;  %s60_s26 = sshll.u32 %s648_s25, 4  ;;  %s49_s23 = int_to_ptr.vmem [resolvable:$true] %s48_s23  ;;  %s725_s26 = int_to_ptr.vmem [resolvable:$true] %s60_s26 }
  0x26   :  { %s569_s29 = scalar_lea.hbm %s817_s4, 512 }
  0x27   :  { %p570_p2 = scmp.ne.s32.totalorder %s817_s4, %s569_s29  ;;  %p573_p3 = scmp.lt.u32.totalorder %s569_s29, %s817_s4 }
  0x29   :  { %p575_p4 = pnand %p573_p3, %p570_p2 }
  0x2b   :  { %578 = shalt.err (!%p575_p4)
}
  0x2c   :  { %s579_s1 = scalar_lea.vmem %s49_s23, 512  ;;  %p584_p6 = scmp.lt.s32.totalorder %s49_s23, %s49_s23 }
  0x2d   :  { %p580_p5 = scmp.ne.s32.totalorder %s49_s23, %s579_s1  ;;  %p585_p7 = scmp.lt.s32.totalorder %s579_s1, %s579_s1 }
  0x2f   :  { %p586_p8 = por %p585_p7, %p584_p6 }
  0x31   :  { %p587_p9 = pnand %p586_p8, %p580_p5 }
  0x33   :  { %590 = shalt.err (!%p587_p9)
}
  0x34   :  { %54 = dma.hbm_to_vmem [thread:$0]  %s817_s4, 512, %s49_s23, [#allocation6], %s645_s9, %s645_s9, %s646_s10  }
  0x35   :  { %s591_s15 = scalar_lea.hbm %s818_s5, 256 }
  0x36   :  { %p592_p10 = scmp.ne.s32.totalorder %s818_s5, %s591_s15  ;;  %p595_p11 = scmp.lt.u32.totalorder %s591_s15, %s818_s5 }
  0x38   :  { %p597_p12 = pnand %p595_p11, %p592_p10 }
  0x3a   :  { %600 = shalt.err (!%p597_p12)
}
  0x3b   :  { %s601_s20 = scalar_lea.vmem %s725_s26, 256  ;;  %p606_p0 = scmp.lt.s32.totalorder %s725_s26, %s725_s26 }
  0x3c   :  { %p602_p13 = scmp.ne.s32.totalorder %s725_s26, %s601_s20  ;;  %p607_p1 = scmp.lt.s32.totalorder %s601_s20, %s601_s20 }
  0x3e   :  { %p608_p2 = por %p607_p1, %p606_p0 }
  0x40   :  { %p609_p3 = pnand %p608_p2, %p602_p13 }
  0x42   :  { %612 = shalt.err (!%p609_p3)
}
  0x43   :  { %66 = dma.hbm_to_vmem [thread:$0]  %s818_s5, 256, %s725_s26, [#allocation9], %s645_s9, %s645_s9, %s646_s10  }
  0x44   :  { %635 = dma.done.wait [#allocation3], 256  }
  0x45   :  { %636 = vsyncadd [#allocation3], 4294967040 }
  0x46   :  { %637 = dma.done.wait [#allocation6], 1024  }
  0x47   :  { %638 = vsyncadd [#allocation6], 4294966272 }
  0x48   :  { %639 = dma.done.wait [#allocation9], 256  }
  0x49   :  { %640 = vsyncadd [#allocation9], 4294967040  ;;  %v83_v0 = vld [vmem:[%s815_s2] sm:$0xff]  ;;  %v84_v1 = vld [vmem:[%s815_s2 + $0x8] sm:$0xff]  ;;  %vm87_vm0 = vcmask 261120   ;;  %s651_s11 = smov 64  }
  0x4a   :  { %v169_v2 = vld [vmem:[#allocation5] sm:$0xff]  ;;  %v483_v3 = vpack.c.bf16 %v84_v1, %v83_v0  ;;  %v170_v4 = vld [vmem:[#allocation5 + $0x8] sm:$0xff]  ;;  %v171_v9 = vld [vmem:[#allocation5 + $0x10] sm:$0xff]  ;;  %s652_s1 = smov [#allocation10]  }
  0x4b   :  { %v85_v5 = vld [vmem:[%s815_s2 + $0x10] sm:$0xff]  ;;  %v86_v6 = vld [vmem:[%s815_s2 + $0x18] sm:$0xff]  ;;  %v491_v7 = vpack.c.bf16 %v170_v4, %v169_v2  ;;  %v172_v10 = vld [vmem:[#allocation5 + $0x18] sm:$0xff]  ;;  %s649_s2 = smov 32   ;;  %s410_s24 = sshll.u32 %s652_s1, 4  ;;  %s411_s24 = int_to_ptr.vmem [resolvable:$true] %s410_s24 }
  0x4c   :  { %v487_v8 = vpack.c.bf16 %v86_v6, %v85_v5  ;;  %v81_v11 = vld [vmem:[%s813_s0] sm:$0xff]  ;;  %484 = vmatprep.subr.bf16.mxu0 %v483_v3  ;;  %v495_v12 = vpack.c.bf16 %v172_v10, %v171_v9  ;;  %v82_v14 = vld [vmem:[%s813_s0 + $0x8] sm:$0xff]  ;;  %v280_v16 = vld [vmem:[#allocation7] sm:$0xff]  ;;  %s650_s0 = smov 96   ;;  %s613_s12 = scalar_lea.vmem %s411_s24, 256 }
  0x4d   :  { %458 = vmatprep.mubr.msk.f32.mxu0 %vm87_vm0, %v81_v11  ;;  %v778_v13 = vld [vmem:[#allocation2] sm:$0xff]  ;;  %492 = vmatprep.subr.bf16.mxu1 %v491_v7  ;;  %v786_v15 = vld [vmem:[#allocation2 + $0x8] sm:$0xff]  ;;  %v281_v17 = vld [vmem:[#allocation7 + $0x8] sm:$0xff]  ;;  %p614_p4 = scmp.ne.s32.totalorder %s411_s24, %s613_s12  ;;  %p618_p5 = scmp.lt.s32.totalorder %s411_s24, %s411_s24 }
  0x4e   :  { %486 = vmatpush3.bf16.msra.mxu0 %v483_v3  ;;  %494 = vmatpush3.bf16.msra.mxu1 %v491_v7  ;;  %v499_v18 = vpack.c.bf16 %v281_v17, %v280_v16  ;;  %v255_v21 = vld [vmem:[#allocation8 + $0x8] sm:$0xff]  ;;  %v254_v25 = vld [vmem:[#allocation8] sm:$0xff]  ;;  %v282_v31 = vld [vmem:[#allocation7 + $0x10] sm:$0xff]  ;;  %p619_p6 = scmp.lt.s32.totalorder %s613_s12, %s613_s12 }
  0x4f   :  { %488 = vmatprep.subr.bf16.mxu0 %v487_v8  ;;  %496 = vmatprep.subr.bf16.mxu1 %v495_v12  ;;  %v283_v32 = vld [vmem:[#allocation7 + $0x18] sm:$0xff] }
  0x50   :  { %469 = vmatprep.mubr.msk.f32.mxu1 %vm87_vm0, %v778_v13  ;;  %272 = vrot.lane.b32.xlu0 %v778_v13, %s649_s2  ;;  %v503_v33 = vpack.c.bf16 %v283_v32, %v282_v31  ;;  %p620_p7 = por %p619_p6, %p618_p5 }
  0x52   :  { %490 = vmatpush3.bf16.msra.mxu0 %v487_v8  ;;  %498 = vmatpush3.bf16.msra.mxu1 %v495_v12  ;;  %p621_p8 = pnand %p620_p7, %p614_p4 }
  0x53   :  { %500 = vmatprep.subr.bf16.mxu0 %v499_v18 }
  0x54   :  { %274 = vrot.lane.b32.xlu0 %v786_v15, %s649_s2 }
  0x55   :  { %459 = vmatmul.mubr.msk.f32.vlgmr.msra.gmra.mrb[0].mxu0 %vm87_vm0, %v82_v14  ;;  %470 = vmatmul.mubr.msk.f32.vlgmr.msra.gmra.mrb[0].mxu1 %vm87_vm0, %v786_v15 }
  0x56   :  { %502 = vmatpush3.bf16.msra.mxu0 %v499_v18 }
  0x57   :  { %504 = vmatprep.subr.bf16.mxu0 %v503_v33 }
  0x5a   :  { %506 = vmatpush3.bf16.msra.mxu0 %v503_v33 }
  0xc2   :  { %v273_v40 = vpop.permute.xlu0 %272 }
  0xc6   :  { %v275_v46 = vpop.permute.xlu0 %274 }
 0x128   :  { %v460_v19 = vpop.f32.mrb[0].mxu0  ;;  %v471_v20 = vpop.f32.mrb[0].mxu1 }
 0x129   :  { %v160_v22 = vpop.f32.mrb[1].mxu0  ;;  %v257_v23 = vadd.f32 %v471_v20, %v460_v19  ;;  %v245_v24 = vpop.f32.mrb[1].mxu1 }
 0x12a   :  { %v256_v26 = vadd.f32 %v245_v24, %v160_v22 }
 0x12b   :  { %v259_v27 = vadd.f32 %v257_v23, %v255_v21 }
 0x12c   :  { %v258_v28 = vadd.f32 %v256_v26, %v254_v25 }
 0x12d   :  { %v261_v29 = vmul.f32 0.5, %v259_v27 }
 0x12e   :  { %v260_v30 = vmul.f32 0.5, %v258_v28 }
 0x12f   :  { %517 = vtanh.f32 %v261_v29 }
 0x130   :  { %519 = vtanh.f32 %v260_v30 }
 0x139   :  { %v518_v34 = vpop.eup %517 }
 0x13a   :  { %v520_v35 = vpop.eup %519  ;;  %v265_v36 = vadd.f32 1.0, %v518_v34 }
 0x13b   :  { %v264_v37 = vadd.f32 1.0, %v520_v35 }
 0x13c   :  { %v267_v38 = vmul.f32 0.5, %v265_v36 }
 0x13d   :  { %v266_v39 = vmul.f32 0.5, %v264_v37 }
 0x13e   :  { %v269_v42 = vmax.f32 %v267_v38, 0.0001 }
 0x13f   :  { %v268_v41 = vmax.f32 %v266_v39, 0.0001 }
 0x140   :  { %v271_v45 = vmin.f32 %v269_v42, 0.9999 }
 0x141   :  { %v270_v43 = vmin.f32 %v268_v41, 0.9999 }
 0x142   :  { %v279_v47 = vmul.f32 %v275_v46, %v271_v45  ;;  %v388_v62 = vsub.f32 1.0, %v271_v45 }
 0x143   :  { %v278_v44 = vmul.f32 %v273_v40, %v270_v43  ;;  %v387_v63 = vsub.f32 1.0, %v270_v43 }
 0x144   :  { %v390_v1 = vmul.f32 %v388_v62, %v786_v15 }
 0x145   :  { %286 = vrot.lane.b32.xlu1 %v278_v44, %s650_s0  ;;  %v389_v4 = vmul.f32 %v387_v63, %v778_v13 }
 0x149   :  { %288 = vrot.lane.b32.xlu1 %v279_v47, %s650_s0 }
 0x1b7   :  { %v287_v48 = vpop.permute.xlu1 %286 }
 0x1b8   :  { %480 = vmatprep.mubr.msk.f32.mxu0 %vm87_vm0, %v287_v48 }
 0x1bb   :  { %v289_v49 = vpop.permute.xlu1 %288 }
 0x1bc   :  { %481 = vmatmul.mubr.msk.f32.vlgmr.msra.gmra.mrb[2].mxu0 %vm87_vm0, %v289_v49 }
 0x28f   :  { %v482_v50 = vpop.f32.mrb[2].mxu0 }
 0x290   :  { %373 = vrot.lane.b32.xlu1 %v482_v50, %s651_s11  ;;  %v360_v51 = vpop.f32.mrb[3].mxu0 }
 0x291   :  { %371 = vrot.lane.b32.xlu0 %v360_v51, %s651_s11 }
 0x302   :  { %v374_v52 = vpop.permute.xlu1 %373 }
 0x303   :  { %v378_v53 = vadd.f32 %v460_v19, %v374_v52  ;;  %v372_v54 = vpop.permute.xlu0 %371 }
 0x304   :  { %v377_v55 = vadd.f32 %v372_v54, %v160_v22 }
 0x305   :  { %v380_v56 = vadd.f32 %v378_v53, %v255_v21 }
 0x306   :  { %v379_v57 = vadd.f32 %v377_v55, %v254_v25 }
 0x307   :  { %521 = vtanh.f32 %v380_v56 }
 0x308   :  { %523 = vtanh.f32 %v379_v57 }
 0x311   :  { %v522_v58 = vpop.eup %521 }
 0x312   :  { %v524_v59 = vpop.eup %523  ;;  %v431_v60 = vclamps-f32 %v522_v58, 0.9999 }
 0x313   :  { %v430_v61 = vclamps-f32 %v524_v59, 0.9999 }
 0x314   :  { %395 = vrot.lane.b32.xlu1 %v431_v60, %s651_s11 }
 0x315   :  { %393 = vrot.lane.b32.xlu0 %v430_v61, %s651_s11 }
 0x386   :  { %v396_v0 = vpop.permute.xlu1 %395 }
 0x387   :  { %v400_v2 = vmul.f32 %v396_v0, %v271_v45  ;;  %v394_v3 = vpop.permute.xlu0 %393 }
 0x388   :  { %v399_v5 = vmul.f32 %v394_v3, %v270_v43 }
 0x389   :  { %v402_v6 = vadd.f32 %v400_v2, %v390_v1 }
 0x38a   :  { %v401_v7 = vadd.f32 %v399_v5, %v389_v4 }
 0x38b   :  { %404 = vst.msk [vmem:[#allocation10 + $0x8] sm:$0xff] %vm87_vm0, %v402_v6 }
 0x38c   :  { %403 = vst.msk [vmem:[#allocation10] sm:$0xff] %vm87_vm0, %v401_v7 }
 0x38d   :  { %624 = shalt.err (!%p621_p8)
}
 0x38e   :  { %s625_s15 = scalar_lea.hbm %s819_s6, 256 }
 0x38f   :  { %p626_p9 = scmp.ne.s32.totalorder %s819_s6, %s625_s15  ;;  %p629_p10 = scmp.lt.u32.totalorder %s625_s15, %s819_s6 }
 0x391   :  { %p631_p11 = pnand %p629_p10, %p626_p9 }
 0x393   :  { %634 = shalt.err (!%p631_p11)
}
 0x394   :  { %416 = dma.vmem_to_hbm [thread:$0]  %s411_s24, 256, %s819_s6, [#allocation4], %s645_s9, %s645_s9, %s646_s10  }
 0x395   :  { %641 = dma.done.wait [#allocation4], 256  }
 0x396   :  { %642 = vsyncadd [#allocation4], 4294967040 }
 0x397   :  { %420 = vsyncpa [#allocation3], 1 }
 0x398   :  { %421 = vsyncpa [#allocation6], 1 }
 0x399   :  { %422 = vsyncpa [#allocation9], 1 }
 0x39a   :  { %423 = vsyncpa [#allocation4], 1 }

</bundles_post_ra>
